<compile_context>
chip_gen: v7x
topology: tpu7x:2x2x1
jax: 0.10.0
libtpu: 0.0.40
codegen_flags: <defaults>
</compile_context>

<pallas_src>
import functools

import jax
import jax.numpy as jnp
from jax.experimental import pallas as pl
from jax.experimental.pallas import tpu as pltpu


def dense_layer_kernel(x_ref, scale_ref, shift_ref, w_ref, mask_ref, out_ref,
                       *, H, W, C, use_bf16_dot=False):
    """Single-block kernel.

    x_ref:     (N, Cp, H*W)     input, channels zero-padded to Cp (mult. of 8)
    scale_ref: (Cp, 1)          folded BN scale  = gamma / sqrt(var + eps)
    shift_ref: (Cp, 1)          folded BN shift  = beta - mean * scale
    w_ref:     (G, 9*Cp)        conv weight, row order (kh*3+kw)*Cp + c
    mask_ref:  (9*Cp, N*H*W)    precomputed border-validity masks (0/1 f32)
    out_ref:   (N, C+G, H*W)    [x, conv(relu(bn(x)))] concatenated on channels
    """
    N, Cp, HW = x_ref.shape
    NHW = N * HW

    # Fold batch into the lane axis: (Cp, N*HW).  256-lane slabs -> no relayout.
    x = jnp.concatenate([x_ref[n] for n in range(N)], axis=1)        # (Cp, NHW)

    # Folded BatchNorm + ReLU, lane-dense over all N*H*W positions at once.
    a = jnp.maximum(x * scale_ref[...] + shift_ref[...], 0.0)        # (Cp, NHW)

    # im2col patch matrix: 9 lane-rolled copies (XLU), stacked along sublanes
    # (each tap is a full 8-row tile), then one precomputed-mask multiply that
    # zeroes taps crossing an image border (and any wrap across the batch fold).
    taps = []
    for dh in (-1, 0, 1):
        for dw in (-1, 0, 1):
            d = dh * W + dw
            taps.append(a if d == 0 else pltpu.roll(a, shift=(-d) % NHW, axis=1))
    patches = jnp.concatenate(taps, axis=0) * mask_ref[...]          # (9Cp, NHW)

    # Single MXU matmul for the whole batch: (G, 9Cp) x (9Cp, N*HW) -> (G, N*HW).
    w_mat = w_ref[...]
    if use_bf16_dot:  # v6e/v7x: bf16-native MXU; requires looser test tolerance.
        w_mat = w_mat.astype(jnp.bfloat16)
        patches = patches.astype(jnp.bfloat16)
    y = jnp.dot(w_mat, patches, preferred_element_type=jnp.float32)  # (G, NHW)

    # Direct channel-concat output: passthrough x (unpadded C rows) + G new
    # channels per batch element; one full-view store per n, 256 lanes each.
    for n in range(N):
        y_n = y[:, n * HW:(n + 1) * HW].astype(out_ref.dtype)
        out_ref[n] = jnp.concatenate([x_ref[n, 0:C, :], y_n], axis=0)


def dense_layer_pallas(x_nchw, gamma, beta, w_oihw, eps=1e-5, use_bf16_dot=False):
    """PyTorch-equivalent DenseLayer forward (training-mode BN). NCHW in/out."""
    N, C, H, W = x_nchw.shape
    G = w_oihw.shape[0]
    HW = H * W
    NHW = N * HW
    Cp = ((C + 7) // 8) * 8  # pad channels to f32 sublane granularity

    x32 = x_nchw.astype(jnp.float32)

    # Training-mode BatchNorm batch statistics (biased variance), folded into a
    # per-channel affine (global reduction -> cheap XLA glue in the wrapper).
    mean = jnp.mean(x32, axis=(0, 2, 3))
    var = jnp.var(x32, axis=(0, 2, 3))
    scale = gamma.astype(jnp.float32) / jnp.sqrt(var + eps)
    shift = beta.astype(jnp.float32) - mean * scale

    # Free reshape NCHW -> (N, C, H*W); zero-pad channels to Cp.
    x_r = x32.reshape(N, C, HW)
    if Cp != C:
        x_r = jnp.pad(x_r, ((0, 0), (0, Cp - C), (0, 0)))
        scale = jnp.pad(scale, (0, Cp - C))
        shift = jnp.pad(shift, (0, Cp - C))

    # Weight (G, C, 3, 3) -> (G, 3, 3, Cp) -> (G, 9*Cp); row order
    # (kh*3+kw)*Cp + c matches the tap-major / channel-minor patch matrix.
    w_t = jnp.transpose(w_oihw.astype(jnp.float32), (0, 2, 3, 1))
    if Cp != C:
        w_t = jnp.pad(w_t, ((0, 0), (0, 0), (0, 0), (0, Cp - C)))
    w2 = w_t.reshape(G, 9 * Cp)

    # Precompute the 9 border-validity masks once (constant), expanded to the
    # (9*Cp, N*HW) patch layout so the kernel applies them with one multiply.
    pos = jnp.arange(NHW, dtype=jnp.int32) % HW
    hh = pos // W
    ww = pos % W
    rows = []
    for dh in (-1, 0, 1):
        for dw in (-1, 0, 1):
            valid = ((hh + dh >= 0) & (hh + dh < H) &
                     (ww + dw >= 0) & (ww + dw < W)).astype(jnp.float32)
            rows.append(jnp.broadcast_to(valid[None, :], (Cp, NHW)))
    mask = jnp.concatenate(rows, axis=0)  # (9*Cp, NHW)

    kernel = functools.partial(dense_layer_kernel, H=H, W=W, C=C,
                               use_bf16_dot=use_bf16_dot)

    out = pl.pallas_call(
        kernel,
        out_shape=jax.ShapeDtypeStruct((N, C + G, HW), jnp.float32),
        grid=(1,),  # whole problem fits comfortably in VMEM at these sizes
        in_specs=[
            pl.BlockSpec((N, Cp, HW), lambda i: (0, 0, 0)),
            pl.BlockSpec((Cp, 1), lambda i: (0, 0)),
            pl.BlockSpec((Cp, 1), lambda i: (0, 0)),
            pl.BlockSpec((G, 9 * Cp), lambda i: (0, 0)),
            pl.BlockSpec((9 * Cp, NHW), lambda i: (0, 0)),
        ],
        out_specs=pl.BlockSpec((N, C + G, HW), lambda i: (0, 0, 0)),
        compiler_params=pltpu.CompilerParams(
            dimension_semantics=("arbitrary",),
            vmem_limit_bytes=32 * 1024 * 1024),
    )(x_r, scale.reshape(Cp, 1), shift.reshape(Cp, 1), w2, mask)

    # Only a free reshape remains in the wrapper; concat is done in-kernel.
    return out.reshape(N, C + G, H, W)


def dense_layer_reference(x_nchw, gamma, beta, w_oihw, eps=1e-5):
    """Pure-JAX reference mirroring the PyTorch forward (training-mode BN)."""
    mean = jnp.mean(x_nchw, axis=(0, 2, 3), keepdims=True)
    var = jnp.var(x_nchw, axis=(0, 2, 3), keepdims=True)
    xn = (x_nchw - mean) / jnp.sqrt(var + eps)
    xn = xn * gamma.reshape(1, -1, 1, 1) + beta.reshape(1, -1, 1, 1)
    act = jnp.maximum(xn, 0.0)
    out = jax.lax.conv_general_dilated(
        act, w_oihw, window_strides=(1, 1), padding=((1, 1), (1, 1)),
        dimension_numbers=("NCHW", "OIHW", "NCHW"))
    return jnp.concatenate([x_nchw, out], axis=1)


if __name__ == "__main__":
    # Small shapes consistent with the module: batch=2, in_channels=4,
    # spatial=16x16, growth_rate=8.
    N, C, H, W, G = 2, 4, 16, 16, 8

    key = jax.random.PRNGKey(0)
    kx, kg, kb, kw = jax.random.split(key, 4)

    x = jax.random.normal(kx, (N, C, H, W), dtype=jnp.float32)
    gamma = 1.0 + 0.1 * jax.random.normal(kg, (C,), dtype=jnp.float32)   # bn.weight
    beta = 0.1 * jax.random.normal(kb, (C,), dtype=jnp.float32)          # bn.bias
    w = 0.1 * jax.random.normal(kw, (G, C, 3, 3), dtype=jnp.float32)     # conv.weight

    out = dense_layer_pallas(x, gamma, beta, w)   # f32 dot path (exact test)
    out = jax.block_until_ready(out)

    ref = dense_layer_reference(x, gamma, beta, w)
    assert out.shape == (N, C + G, H, W), out.shape
    assert jnp.allclose(out, ref, rtol=1e-4, atol=1e-4), (
        float(jnp.max(jnp.abs(out - ref))))

    print("KERNEL_OK")
</pallas_src>

<mosaic_0001>
module attributes {stable_mosaic.version = 11 : i64} {
  func.func @dense_layer_kernel(%arg0: i32, %arg1: memref<2x8x256xf32, #tpu.memory_space<vmem>>, %arg2: memref<8x1xf32, #tpu.memory_space<vmem>>, %arg3: memref<8x1xf32, #tpu.memory_space<vmem>>, %arg4: memref<8x72xf32, #tpu.memory_space<vmem>>, %arg5: memref<72x512xf32, #tpu.memory_space<vmem>>, %arg6: memref<2x12x256xf32, #tpu.memory_space<vmem>>) attributes {dimension_semantics = [#tpu.dimension_semantics<arbitrary>], iteration_bounds = array<i64: 1>, scalar_prefetch = 0 : i64, scratch_operands = 0 : i64, tpu.core_type = #tpu.core_type<tc>, window_params = [{pipeline_mode = #tpu.pipeline_mode<synchronous>, transform_indices = @transform_0, window_bounds = array<i64: 2, 8, 256>}, {pipeline_mode = #tpu.pipeline_mode<synchronous>, transform_indices = @transform_1, window_bounds = array<i64: 8, 1>}, {pipeline_mode = #tpu.pipeline_mode<synchronous>, transform_indices = @transform_2, window_bounds = array<i64: 8, 1>}, {pipeline_mode = #tpu.pipeline_mode<synchronous>, transform_indices = @transform_3, window_bounds = array<i64: 8, 72>}, {pipeline_mode = #tpu.pipeline_mode<synchronous>, transform_indices = @transform_4, window_bounds = array<i64: 72, 512>}, {pipeline_mode = #tpu.pipeline_mode<synchronous>, transform_indices = @transform_5, window_bounds = array<i64: 2, 12, 256>}]} {
    %c0 = arith.constant 0 : index
    %c0_0 = arith.constant 0 : index
    %c0_1 = arith.constant 0 : index
    %0 = vector.load %arg1[%c0, %c0_0, %c0_1] : memref<2x8x256xf32, #tpu.memory_space<vmem>>, vector<1x8x256xf32>
    %1 = vector.shape_cast %0 : vector<1x8x256xf32> to vector<8x256xf32>
    %c1 = arith.constant 1 : index
    %c0_2 = arith.constant 0 : index
    %c0_3 = arith.constant 0 : index
    %2 = vector.load %arg1[%c1, %c0_2, %c0_3] : memref<2x8x256xf32, #tpu.memory_space<vmem>>, vector<1x8x256xf32>
    %3 = vector.shape_cast %2 : vector<1x8x256xf32> to vector<8x256xf32>
    %4 = tpu.concatenate %1, %3 in 1 : vector<8x256xf32>, vector<8x256xf32> -> vector<8x512xf32>
    %c0_4 = arith.constant 0 : index
    %c0_5 = arith.constant 0 : index
    %5 = vector.load %arg2[%c0_4, %c0_5] : memref<8x1xf32, #tpu.memory_space<vmem>>, vector<8x1xf32>
    %6 = vector.broadcast %5 : vector<8x1xf32> to vector<8x512xf32>
    %7 = arith.mulf %4, %6 : vector<8x512xf32>
    %c0_6 = arith.constant 0 : index
    %c0_7 = arith.constant 0 : index
    %8 = vector.load %arg3[%c0_6, %c0_7] : memref<8x1xf32, #tpu.memory_space<vmem>>, vector<8x1xf32>
    %9 = vector.broadcast %8 : vector<8x1xf32> to vector<8x512xf32>
    %10 = arith.addf %7, %9 : vector<8x512xf32>
    %cst = arith.constant 0.000000e+00 : f32
    %11 = vector.broadcast %cst : f32 to vector<8x512xf32>
    %12 = arith.maximumf %10, %11 : vector<8x512xf32>
    %c17_i32 = arith.constant 17 : i32
    %13 = tpu.dynamic_rotate %12 by %c17_i32 dim 1 : vector<8x512xf32>, i32 -> vector<8x512xf32>
    %c16_i32 = arith.constant 16 : i32
    %14 = tpu.dynamic_rotate %12 by %c16_i32 dim 1 : vector<8x512xf32>, i32 -> vector<8x512xf32>
    %c15_i32 = arith.constant 15 : i32
    %15 = tpu.dynamic_rotate %12 by %c15_i32 dim 1 : vector<8x512xf32>, i32 -> vector<8x512xf32>
    %c1_i32 = arith.constant 1 : i32
    %16 = tpu.dynamic_rotate %12 by %c1_i32 dim 1 : vector<8x512xf32>, i32 -> vector<8x512xf32>
    %c511_i32 = arith.constant 511 : i32
    %17 = tpu.dynamic_rotate %12 by %c511_i32 dim 1 : vector<8x512xf32>, i32 -> vector<8x512xf32>
    %c497_i32 = arith.constant 497 : i32
    %18 = tpu.dynamic_rotate %12 by %c497_i32 dim 1 : vector<8x512xf32>, i32 -> vector<8x512xf32>
    %c496_i32 = arith.constant 496 : i32
    %19 = tpu.dynamic_rotate %12 by %c496_i32 dim 1 : vector<8x512xf32>, i32 -> vector<8x512xf32>
    %c495_i32 = arith.constant 495 : i32
    %20 = tpu.dynamic_rotate %12 by %c495_i32 dim 1 : vector<8x512xf32>, i32 -> vector<8x512xf32>
    %21 = tpu.concatenate %13, %14, %15, %16, %12, %17, %18, %19, %20 in 0 : vector<8x512xf32>, vector<8x512xf32>, vector<8x512xf32>, vector<8x512xf32>, vector<8x512xf32>, vector<8x512xf32>, vector<8x512xf32>, vector<8x512xf32>, vector<8x512xf32> -> vector<72x512xf32>
    %c0_8 = arith.constant 0 : index
    %c0_9 = arith.constant 0 : index
    %22 = vector.load %arg5[%c0_8, %c0_9] : memref<72x512xf32, #tpu.memory_space<vmem>>, vector<72x512xf32>
    %23 = arith.mulf %21, %22 : vector<72x512xf32>
    %c0_10 = arith.constant 0 : index
    %c0_11 = arith.constant 0 : index
    %24 = vector.load %arg4[%c0_10, %c0_11] : memref<8x72xf32, #tpu.memory_space<vmem>>, vector<8x72xf32>
    %cst_12 = arith.constant dense<0.000000e+00> : vector<8x512xf32>
    %25 = tpu.matmul %24, %23, %cst_12 {dimension_numbers = #tpu.dot_dimension_numbers<[1], [0], [0], [1], [0, 0, 1, 1], [], []>} : vector<8x72xf32>, vector<72x512xf32>, vector<8x512xf32> -> vector<8x512xf32>
    %26 = vector.extract_strided_slice %25 {offsets = [0, 0], sizes = [8, 256], strides = [1, 1]} : vector<8x512xf32> to vector<8x256xf32>
    %c0_13 = arith.constant 0 : index
    %c0_14 = arith.constant 0 : index
    %c0_15 = arith.constant 0 : index
    %27 = vector.load %arg1[%c0_13, %c0_14, %c0_15] : memref<2x8x256xf32, #tpu.memory_space<vmem>>, vector<1x4x256xf32>
    %28 = vector.shape_cast %27 : vector<1x4x256xf32> to vector<4x256xf32>
    %29 = tpu.concatenate %28, %26 in 0 : vector<4x256xf32>, vector<8x256xf32> -> vector<12x256xf32>
    %c0_16 = arith.constant 0 : index
    %c0_17 = arith.constant 0 : index
    %c0_18 = arith.constant 0 : index
    %30 = vector.load %arg6[%c0_16, %c0_17, %c0_18] : memref<2x12x256xf32, #tpu.memory_space<vmem>>, vector<1x12x256xf32>
    %31 = vector.shape_cast %30 : vector<1x12x256xf32> to vector<12x256xf32>
    %32 = vector.shape_cast %29 : vector<12x256xf32> to vector<1x12x256xf32>
    tpu.vector_store %arg6[%c0_16, %c0_17, %c0_18], %32 {strides = array<i32>} : memref<2x12x256xf32, #tpu.memory_space<vmem>>, vector<1x12x256xf32>,
    %33 = vector.extract_strided_slice %25 {offsets = [0, 256], sizes = [8, 256], strides = [1, 1]} : vector<8x512xf32> to vector<8x256xf32>
    %c1_19 = arith.constant 1 : index
    %c0_20 = arith.constant 0 : index
    %c0_21 = arith.constant 0 : index
    %34 = vector.load %arg1[%c1_19, %c0_20, %c0_21] : memref<2x8x256xf32, #tpu.memory_space<vmem>>, vector<1x4x256xf32>
    %35 = vector.shape_cast %34 : vector<1x4x256xf32> to vector<4x256xf32>
    %36 = tpu.concatenate %35, %33 in 0 : vector<4x256xf32>, vector<8x256xf32> -> vector<12x256xf32>
    %c1_22 = arith.constant 1 : index
    %c0_23 = arith.constant 0 : index
    %c0_24 = arith.constant 0 : index
    %37 = vector.load %arg6[%c1_22, %c0_23, %c0_24] : memref<2x12x256xf32, #tpu.memory_space<vmem>>, vector<1x12x256xf32>
    %38 = vector.shape_cast %37 : vector<1x12x256xf32> to vector<12x256xf32>
    %39 = vector.shape_cast %36 : vector<12x256xf32> to vector<1x12x256xf32>
    tpu.vector_store %arg6[%c1_22, %c0_23, %c0_24], %39 {strides = array<i32>} : memref<2x12x256xf32, #tpu.memory_space<vmem>>, vector<1x12x256xf32>,
    return
  }
  func.func @transform_0(%arg0: i32) -> (i32, i32, i32) {
    %c0_i32 = arith.constant 0 : i32
    %c0_i32_0 = arith.constant 0 : i32
    %c0_i32_1 = arith.constant 0 : i32
    %c0_i32_2 = arith.constant 0 : i32
    return %c0_i32, %c0_i32_0, %c0_i32_1 : i32, i32, i32
  }
  func.func @transform_1(%arg0: i32) -> (i32, i32) {
    %c0_i32 = arith.constant 0 : i32
    %c0_i32_0 = arith.constant 0 : i32
    %c0_i32_1 = arith.constant 0 : i32
    return %c0_i32, %c0_i32_0 : i32, i32
  }
  func.func @transform_2(%arg0: i32) -> (i32, i32) {
    %c0_i32 = arith.constant 0 : i32
    %c0_i32_0 = arith.constant 0 : i32
    %c0_i32_1 = arith.constant 0 : i32
    return %c0_i32, %c0_i32_0 : i32, i32
  }
  func.func @transform_3(%arg0: i32) -> (i32, i32) {
    %c0_i32 = arith.constant 0 : i32
    %c0_i32_0 = arith.constant 0 : i32
    %c0_i32_1 = arith.constant 0 : i32
    return %c0_i32, %c0_i32_0 : i32, i32
  }
  func.func @transform_4(%arg0: i32) -> (i32, i32) {
    %c0_i32 = arith.constant 0 : i32
    %c0_i32_0 = arith.constant 0 : i32
    %c0_i32_1 = arith.constant 0 : i32
    return %c0_i32, %c0_i32_0 : i32, i32
  }
  func.func @transform_5(%arg0: i32) -> (i32, i32, i32) {
    %c0_i32 = arith.constant 0 : i32
    %c0_i32_0 = arith.constant 0 : i32
    %c0_i32_1 = arith.constant 0 : i32
    %c0_i32_2 = arith.constant 0 : i32
    return %c0_i32, %c0_i32_0, %c0_i32_1 : i32, i32, i32
  }
}

</mosaic_0001>

<bundles_post_ra>
// kernel: tpu_custom_call.1
= control target key start
LH: loop header
LB: loop body
LE: loop exit
PB: predicated region body
PF: predicated region fallthrough
CT: control target
= control target key end

     0   :  { %10 = vsyncpa [#allocation3], 0  ;;  %s769_s0 = inlined_call_operand.hbm [shape: f32[2,8,256], index: 0, kind: input, shape index: {}]   ;;  %s770_s1 = inlined_call_operand.vmem [shape: f32[8,1], index: 1, kind: input, shape index: {}]   ;;  %s771_s2 = inlined_call_operand.vmem [shape: f32[8,1], index: 2, kind: input, shape index: {}]   ;;  %s772_s3 = inlined_call_operand.vmem [shape: f32[8,72], index: 3, kind: input, shape index: {}]   ;;  %s773_s4 = inlined_call_operand.hbm [shape: f32[72,512], index: 4, kind: input, shape index: {}]   ;;  %s774_s5 = inlined_call_operand.vmem [shape: f32[2,12,256], index: 5, kind: output, shape index: {}]  }
   0x1   :  { %11 = vsyncpa [#allocation5], 0  ;;  %s540_s18 = smov [#allocation2]   ;;  %s492_s22 = scalar_lea.hbm %s769_s0, 512 }
   0x2   :  { %s17_s19 = sshll.u32 %s540_s18, 4  ;;  %p493_p0 = scmp.ne.s32.totalorder %s769_s0, %s492_s22  ;;  %s18_s19 = int_to_ptr.vmem [resolvable:$true] %s17_s19 }
   0x3   :  { %p496_p1 = scmp.lt.u32.totalorder %s492_s22, %s769_s0 }
   0x5   :  { %p498_p2 = pnand %p496_p1, %p493_p0 }
   0x7   :  { %501 = shalt.err (!%p498_p2)
}
   0x8   :  { %s502_s27 = scalar_lea.vmem %s18_s19, 512  ;;  %p507_p4 = scmp.lt.s32.totalorder %s18_s19, %s18_s19 }
   0x9   :  { %p503_p3 = scmp.ne.s32.totalorder %s18_s19, %s502_s27  ;;  %p508_p5 = scmp.lt.s32.totalorder %s502_s27, %s502_s27 }
   0xb   :  { %p509_p6 = por %p508_p5, %p507_p4 }
   0xd   :  { %p510_p7 = pnand %p509_p6, %p503_p3 }
   0xf   :  { %513 = shalt.err (!%p510_p7)
}
  0x10   :  { %s541_s28 = smov 256   ;;  %s542_s29 = smov 16  }
  0x11   :  { %23 = dma.hbm_to_vmem [thread:$0]  %s769_s0, 512, %s18_s19, [#allocation3], %s541_s28, %s541_s28, %s542_s29  }
  0x12   :  { %s543_s7 = smov [#allocation4]   ;;  %s514_s11 = scalar_lea.hbm %s773_s4, 4608 }
  0x13   :  { %s35_s8 = sshll.u32 %s543_s7, 4  ;;  %p515_p8 = scmp.ne.s32.totalorder %s773_s4, %s514_s11  ;;  %s36_s8 = int_to_ptr.vmem [resolvable:$true] %s35_s8 }
  0x14   :  { %p518_p9 = scmp.lt.u32.totalorder %s514_s11, %s773_s4 }
  0x16   :  { %p520_p10 = pnand %p518_p9, %p515_p8 }
  0x18   :  { %523 = shalt.err (!%p520_p10)
}
  0x19   :  { %s524_s16 = scalar_lea.vmem %s36_s8, 4608  ;;  %p529_p12 = scmp.lt.s32.totalorder %s36_s8, %s36_s8 }
  0x1a   :  { %p525_p11 = scmp.ne.s32.totalorder %s36_s8, %s524_s16  ;;  %p530_p13 = scmp.lt.s32.totalorder %s524_s16, %s524_s16 }
  0x1c   :  { %p531_p0 = por %p530_p13, %p529_p12 }
  0x1e   :  { %p532_p1 = pnand %p531_p0, %p525_p11 }
  0x20   :  { %535 = shalt.err (!%p532_p1)
}
  0x21   :  { %s544_s0 = smov 512   ;;  %s545_s17 = smov 32  }
  0x22   :  { %41 = dma.hbm_to_vmem [thread:$0]  %s773_s4, 4608, %s36_s8, [#allocation5], %s544_s0, %s544_s0, %s545_s17  }
  0x23   :  { %536 = dma.done.wait [#allocation3], 512  }
  0x24   :  { %537 = vsyncadd [#allocation3], 4294966784 }
  0x25   :  { %538 = dma.done.wait [#allocation5], 4608  }
  0x26   :  { %539 = vsyncadd [#allocation5], 4294962688  ;;  %v546_v0 = vmov 0   ;;  %v53_v1 = vld [vmem:[%s770_s1] sm:$0xff]  ;;  %v51_v5 = vld [vmem:[#allocation2 + $0x10] sm:$0xff]  ;;  %s547_s1 = smov 17   ;;  %v85_v24 = vlaneseq }
  0x27   :  { %491 = vset.pattern.permute.xlu0 %v546_v0  ;;  %v63_v2 = vld [vmem:[%s771_s2] sm:$0xff]  ;;  %v49_v6 = vld [vmem:[#allocation2 + $0x8] sm:$0xff]  ;;  %v52_v13 = vld [vmem:[#allocation2 + $0x18] sm:$0xff]  ;;  %s548_s2 = smov 15   ;;  %s549_s4 = smov 1   ;;  %v554_v21 = vmov 0.0  }
  0x28   :  { %56 = vperm.xlu0 %491, %v53_v1   ;;  %v48_v4 = vld [vmem:[#allocation2] sm:$0xff]  ;;  %s550_s24 = smov 127   ;;  %s551_s25 = smov 113   ;;  %324 = vmatprep.mubr.f32.mxu0 %v554_v21  ;;  %v660_v26 = vand.u32 127, %v85_v24  ;;  %v184_v31 = vld [vmem:[#allocation4 + $0x8] sm:$0xff]  ;;  %v189_v37 = vld [vmem:[#allocation4 + $0x30] sm:$0xff] }
  0x29   :  { %s552_s26 = smov 112   ;;  %s553_s27 = smov 111   ;;  %395 = vmatprep.mubr.f32.mxu1 %v554_v21  ;;  %v188_v32 = vld [vmem:[#allocation4 + $0x28] sm:$0xff]  ;;  %v183_v36 = vld [vmem:[#allocation4] sm:$0xff]  ;;  %v186_v44 = vld [vmem:[#allocation4 + $0x18] sm:$0xff]  ;;  %vm256_vm8 = vcmask 588800  }
  0x2a   :  { %vm87_vm0 = vcmp.lt.s32.totalorder %v660_v26, 17  ;;  %vm100_vm1 = vcmp.lt.s32.totalorder %v660_v26, 16  ;;  %v187_v43 = vld [vmem:[#allocation4 + $0x20] sm:$0xff]  ;;  %v190_v45 = vld [vmem:[#allocation4 + $0x38] sm:$0xff]  ;;  %v185_v46 = vld [vmem:[#allocation4 + $0x10] sm:$0xff]  ;;  %vm113_vm2 = vcmp.lt.s32.totalorder %v660_v26, 15 }
  0x2b   :  { %vm126_vm3 = vcmp.lt.s32.totalorder %v660_v26, 1  ;;  %v198_v21 = vld [vmem:[#allocation4 + $0x78] sm:$0xff]  ;;  %vm139_vm4 = vcmp.lt.s32.totalorder %v660_v26, 127  ;;  %vm152_vm5 = vcmp.lt.s32.totalorder %v660_v26, 113  ;;  %vm165_vm6 = vcmp.lt.s32.totalorder %v660_v26, 112 }
  0x2c   :  { %66 = vperm.xlu0 %491, %v63_v2   ;;  %v192_v2 = vld [vmem:[#allocation4 + $0x48] sm:$0xff]  ;;  %vm178_vm7 = vcmp.lt.s32.totalorder %v660_v26, 111  ;;  %vm410_vm9 = vcmask 1043456  }
  0xa7   :  { %v57_v3 = vpop.permute.xlu0 %56 }
  0xa8   :  { %v59_v7 = vmul.f32 %v57_v3, %v48_v4  ;;  %v61_v8 = vmul.f32 %v57_v3, %v51_v5  ;;  %v60_v10 = vmul.f32 %v57_v3, %v49_v6  ;;  %v62_v17 = vmul.f32 %v57_v3, %v52_v13  ;;  %v196_v4 = vld [vmem:[#allocation4 + $0x68] sm:$0xff]  ;;  %v194_v13 = vld [vmem:[#allocation4 + $0x58] sm:$0xff] }
  0xab   :  { %v67_v9 = vpop.permute.xlu0 %66 }
  0xac   :  { %v69_v11 = vadd.f32 %v67_v9, %v59_v7  ;;  %v71_v12 = vadd.f32 %v67_v9, %v61_v8  ;;  %v70_v14 = vadd.f32 %v67_v9, %v60_v10  ;;  %v72_v18 = vadd.f32 %v67_v9, %v62_v17  ;;  %v191_v9 = vld [vmem:[#allocation4 + $0x40] sm:$0xff]  ;;  %v197_v10 = vld [vmem:[#allocation4 + $0x70] sm:$0xff] }
  0xae   :  { %v616_v15 = vmax.f32 %v69_v11, 0.0  ;;  %v618_v16 = vmax.f32 %v71_v12, 0.0  ;;  %v622_v19 = vmax.f32 %v70_v14, 0.0  ;;  %v627_v20 = vmax.f32 %v72_v18, 0.0  ;;  %v195_v18 = vld [vmem:[#allocation4 + $0x60] sm:$0xff] }
  0xb0   :  { %81 = vrot.lane.b32.xlu0 %v618_v16, %s547_s1  ;;  %77 = vrot.lane.b32.xlu1 %v616_v15, %s547_s1 }
  0xb4   :  { %92 = vrot.lane.b32.xlu0 %v616_v15, %s542_s29  ;;  %79 = vrot.lane.b32.xlu1 %v622_v19, %s547_s1 }
  0xb8   :  { %96 = vrot.lane.b32.xlu0 %v618_v16, %s542_s29  ;;  %83 = vrot.lane.b32.xlu1 %v627_v20, %s547_s1 }
  0xbc   :  { %105 = vrot.lane.b32.xlu0 %v616_v15, %s548_s2  ;;  %94 = vrot.lane.b32.xlu1 %v622_v19, %s542_s29 }
  0xc0   :  { %109 = vrot.lane.b32.xlu0 %v618_v16, %s548_s2  ;;  %98 = vrot.lane.b32.xlu1 %v627_v20, %s542_s29 }
  0xc4   :  { %118 = vrot.lane.b32.xlu0 %v616_v15, %s549_s4  ;;  %107 = vrot.lane.b32.xlu1 %v622_v19, %s548_s2 }
  0xc8   :  { %122 = vrot.lane.b32.xlu0 %v618_v16, %s549_s4  ;;  %111 = vrot.lane.b32.xlu1 %v627_v20, %s548_s2 }
  0xcc   :  { %131 = vrot.lane.b32.xlu0 %v616_v15, %s550_s24  ;;  %120 = vrot.lane.b32.xlu1 %v622_v19, %s549_s4 }
  0xd0   :  { %135 = vrot.lane.b32.xlu0 %v618_v16, %s550_s24  ;;  %124 = vrot.lane.b32.xlu1 %v627_v20, %s549_s4 }
  0xd4   :  { %144 = vrot.lane.b32.xlu0 %v616_v15, %s551_s25  ;;  %133 = vrot.lane.b32.xlu1 %v622_v19, %s550_s24 }
  0xd8   :  { %148 = vrot.lane.b32.xlu0 %v618_v16, %s551_s25  ;;  %137 = vrot.lane.b32.xlu1 %v627_v20, %s550_s24 }
  0xdc   :  { %157 = vrot.lane.b32.xlu0 %v616_v15, %s552_s26  ;;  %146 = vrot.lane.b32.xlu1 %v622_v19, %s551_s25 }
  0xe0   :  { %161 = vrot.lane.b32.xlu0 %v618_v16, %s552_s26  ;;  %150 = vrot.lane.b32.xlu1 %v627_v20, %s551_s25 }
  0xe4   :  { %170 = vrot.lane.b32.xlu0 %v616_v15, %s553_s27  ;;  %159 = vrot.lane.b32.xlu1 %v622_v19, %s552_s26 }
  0xe8   :  { %174 = vrot.lane.b32.xlu0 %v618_v16, %s553_s27  ;;  %163 = vrot.lane.b32.xlu1 %v627_v20, %s552_s26 }
  0xec   :  { %172 = vrot.lane.b32.xlu1 %v622_v19, %s553_s27 }
  0xf0   :  { %176 = vrot.lane.b32.xlu1 %v627_v20, %s553_s27 }
 0x122   :  { %v82_v22 = vpop.permute.xlu0 %81  ;;  %v78_v23 = vpop.permute.xlu1 %77 }
 0x126   :  { %v93_v25 = vpop.permute.xlu0 %92  ;;  %v80_v27 = vpop.permute.xlu1 %79 }
 0x127   :  { %v90_v30 = vsel %vm87_vm0, %v78_v23, %v80_v27  ;;  %v89_v47 = vsel %vm87_vm0, %v80_v27, %v82_v22 }
 0x128   :  { %v220_v39 = vmul.f32 %v184_v31, %v90_v30  ;;  %v221_v58 = vmul.f32 %v185_v46, %v89_v47 }
 0x12a   :  { %v97_v28 = vpop.permute.xlu0 %96  ;;  %v84_v29 = vpop.permute.xlu1 %83 }
 0x12b   :  { %v88_v41 = vsel %vm87_vm0, %v82_v22, %v84_v29  ;;  %v91_v42 = vsel %vm87_vm0, %v84_v29, %v78_v23  ;;  %v193_v22 = vld [vmem:[#allocation4 + $0x50] sm:$0xff] }
 0x12c   :  { %v219_v54 = vmul.f32 %v183_v36, %v91_v42  ;;  %v222_v56 = vmul.f32 %v186_v44, %v88_v41 }
 0x12e   :  { %v106_v33 = vpop.permute.xlu0 %105  ;;  %v95_v34 = vpop.permute.xlu1 %94 }
 0x12f   :  { %v103_v35 = vsel %vm100_vm1, %v93_v25, %v95_v34  ;;  %v102_v38 = vsel %vm100_vm1, %v95_v34, %v97_v28 }
 0x130   :  { %v224_v40 = vmul.f32 %v188_v32, %v103_v35  ;;  %v225_v51 = vmul.f32 %v189_v37, %v102_v38  ;;  %v200_v35 = vld [vmem:[#allocation4 + $0x88] sm:$0xff]  ;;  %v203_v37 = vld [vmem:[#allocation4 + $0xa0] sm:$0xff] }
 0x131   :  { %v204_v38 = vld [vmem:[#allocation4 + $0xa8] sm:$0xff]  ;;  %v236_v47 = vmul.f32 %v200_v35, %v622_v19 }
 0x132   :  { %v110_v48 = vpop.permute.xlu0 %109  ;;  %v99_v49 = vpop.permute.xlu1 %98  ;;  %v444_v50 = vpack.c.bf16 %v224_v40, %v220_v39  ;;  %v462_v63 = vpack.c.bf16 %v225_v51, %v221_v58  ;;  %v199_v39 = vld [vmem:[#allocation4 + $0x80] sm:$0xff]  ;;  %v202_v51 = vld [vmem:[#allocation4 + $0x98] sm:$0xff] }
 0x133   :  { %v101_v52 = vsel %vm100_vm1, %v97_v28, %v99_v49  ;;  %v104_v53 = vsel %vm100_vm1, %v99_v49, %v93_v25 }
 0x134   :  { %v223_v55 = vmul.f32 %v187_v43, %v104_v53  ;;  %445 = vmatprep.subr.bf16.mxu0 %v444_v50  ;;  %v226_v57 = vmul.f32 %v190_v45, %v101_v52  ;;  %v235_v50 = vmul.f32 %v199_v39, %v616_v15  ;;  %v205_v52 = vld [vmem:[#allocation4 + $0xb0] sm:$0xff]  ;;  %v206_v53 = vld [vmem:[#allocation4 + $0xb8] sm:$0xff]  ;;  %v238_v15 = vmul.f32 %v202_v51, %v627_v20 }
 0x136   :  { %v119_v59 = vpop.permute.xlu0 %118  ;;  %v108_v60 = vpop.permute.xlu1 %107  ;;  %v446_v61 = vpack.c.bf16 %v223_v55, %v219_v54  ;;  %v460_v62 = vpack.c.bf16 %v226_v57, %v222_v56  ;;  %v201_v54 = vld [vmem:[#allocation4 + $0x90] sm:$0xff] }
 0x137   :  { %v116_v3 = vsel %vm113_vm2, %v106_v33, %v108_v60  ;;  %v115_v23 = vsel %vm113_vm2, %v108_v60, %v110_v48 }
 0x138   :  { %447 = vmatpush1.bf16.msra.mxu0 %v446_v61  ;;  %461 = vmatprep.subr.bf16.mxu1 %v460_v62  ;;  %v228_v8 = vmul.f32 %v192_v2, %v116_v3  ;;  %v229_v36 = vmul.f32 %v193_v22, %v115_v23  ;;  %v237_v62 = vmul.f32 %v201_v54, %v618_v16  ;;  %v210_v22 = vld [vmem:[#allocation4 + $0xd8] sm:$0xff] }
 0x139   :  { %463 = vmatpush1.bf16.msra.mxu1 %v462_v63 }
 0x13a   :  { %v123_v0 = vpop.permute.xlu0 %122  ;;  %v112_v1 = vpop.permute.xlu1 %111 }
 0x13b   :  { %v114_v14 = vsel %vm113_vm2, %v110_v48, %v112_v1  ;;  %v117_v17 = vsel %vm113_vm2, %v112_v1, %v106_v33 }
 0x13c   :  { %v227_v31 = vmul.f32 %v191_v9, %v117_v17  ;;  %v230_v32 = vmul.f32 %v194_v13, %v114_v14  ;;  %v209_v14 = vld [vmem:[#allocation4 + $0xd0] sm:$0xff] }
 0x13e   :  { %v132_v5 = vpop.permute.xlu0 %131  ;;  %v121_v6 = vpop.permute.xlu1 %120 }
 0x13f   :  { %v129_v7 = vsel %vm126_vm3, %v119_v59, %v121_v6  ;;  %v128_v11 = vsel %vm126_vm3, %v121_v6, %v123_v0  ;;  %v207_v6 = vld [vmem:[#allocation4 + $0xc0] sm:$0xff] }
 0x140   :  { %v232_v12 = vmul.f32 %v196_v4, %v129_v7  ;;  %v233_v28 = vmul.f32 %v197_v10, %v128_v11  ;;  %v211_v7 = vld [vmem:[#allocation4 + $0xe0] sm:$0xff] }
 0x142   :  { %v136_v24 = vpop.permute.xlu0 %135  ;;  %v125_v25 = vpop.permute.xlu1 %124  ;;  %v448_v27 = vpack.c.bf16 %v232_v12, %v228_v8  ;;  %v466_v46 = vpack.c.bf16 %v233_v28, %v229_v36  ;;  %v212_v8 = vld [vmem:[#allocation4 + $0xe8] sm:$0xff] }
 0x143   :  { %v127_v29 = vsel %vm126_vm3, %v123_v0, %v125_v25  ;;  %v130_v30 = vsel %vm126_vm3, %v125_v25, %v119_v59  ;;  %v213_v25 = vld [vmem:[#allocation4 + $0xf0] sm:$0xff] }
 0x144   :  { %v231_v33 = vmul.f32 %v195_v18, %v130_v30  ;;  %v234_v34 = vmul.f32 %v198_v21, %v127_v29  ;;  %449 = vmatprep.subr.bf16.mxu0 %v448_v27  ;;  %v214_v27 = vld [vmem:[#allocation4 + $0xf8] sm:$0xff] }
 0x146   :  { %v145_v40 = vpop.permute.xlu0 %144  ;;  %v134_v41 = vpop.permute.xlu1 %133  ;;  %v450_v42 = vpack.c.bf16 %v231_v33, %v227_v31  ;;  %v464_v43 = vpack.c.bf16 %v234_v34, %v230_v32 }
 0x147   :  { %v141_v44 = vsel %vm139_vm4, %v134_v41, %v136_v24  ;;  %v142_v45 = vsel %vm139_vm4, %v132_v5, %v134_v41 }
 0x148   :  { %v239_v48 = vmul.f32 %v203_v37, %v142_v45  ;;  %v240_v49 = vmul.f32 %v204_v38, %v141_v44  ;;  %451 = vmatpush1.bf16.msra.mxu0 %v450_v42  ;;  %465 = vmatprep.subr.bf16.mxu1 %v464_v43  ;;  %v215_v37 = vld [vmem:[#allocation4 + $0x100] sm:$0xff]  ;;  %v216_v38 = vld [vmem:[#allocation4 + $0x108] sm:$0xff] }
 0x149   :  { %467 = vmatpush1.bf16.msra.mxu1 %v466_v46 }
 0x14a   :  { %v149_v55 = vpop.permute.xlu0 %148  ;;  %v138_v56 = vpop.permute.xlu1 %137  ;;  %v452_v57 = vpack.c.bf16 %v240_v49, %v236_v47  ;;  %v454_v58 = vpack.c.bf16 %v239_v48, %v235_v50  ;;  %v217_v47 = vld [vmem:[#allocation4 + $0x110] sm:$0xff]  ;;  %v218_v48 = vld [vmem:[#allocation4 + $0x118] sm:$0xff]  ;;  %v255_v49 = vld [vmem:[%s772_s3] sm:$0xff] }
 0x14b   :  { %v140_v59 = vsel %vm139_vm4, %v136_v24, %v138_v56  ;;  %v143_v19 = vsel %vm139_vm4, %v138_v56, %v132_v5  ;;  %v208_v5 = vld [vmem:[#allocation4 + $0xc8] sm:$0xff]  ;;  %v402_v56 = vld [vmem:[#allocation2] sm:$0xf] }
 0x14c   :  { %v241_v60 = vmul.f32 %v205_v52, %v140_v59  ;;  %v242_v61 = vmul.f32 %v206_v53, %v143_v19  ;;  %453 = vmatprep.subr.bf16.mxu0 %v452_v57  ;;  %v403_v59 = vld [vmem:[#allocation2 + $0x8] sm:$0xf] }
 0x14d   :  { %455 = vmatpush1.bf16.msra.mxu0 %v454_v58 }
 0x14e   :  { %v158_v63 = vpop.permute.xlu0 %157  ;;  %v147_v0 = vpop.permute.xlu1 %146  ;;  %v468_v1 = vpack.c.bf16 %v242_v61, %v238_v15  ;;  %v470_v2 = vpack.c.bf16 %v241_v60, %v237_v62  ;;  %v417_v15 = vld [vmem:[#allocation2 + $0x10] sm:$0xf] }
 0x14f   :  { %v154_v20 = vsel %vm152_vm5, %v147_v0, %v149_v55  ;;  %v155_v16 = vsel %vm152_vm5, %v145_v40, %v147_v0  ;;  %v418_v0 = vld [vmem:[#allocation2 + $0x18] sm:$0xf] }
 0x150   :  { %469 = vmatprep.subr.bf16.mxu1 %v468_v1  ;;  %v243_v12 = vmul.f32 %v207_v6, %v155_v16  ;;  %v244_v13 = vmul.f32 %v208_v5, %v154_v20 }
 0x151   :  { %471 = vmatpush1.bf16.msra.mxu1 %v470_v2 }
 0x152   :  { %v162_v3 = vpop.permute.xlu0 %161  ;;  %v151_v4 = vpop.permute.xlu1 %150 }
 0x153   :  { %v153_v23 = vsel %vm152_vm5, %v149_v55, %v151_v4  ;;  %v156_v24 = vsel %vm152_vm5, %v151_v4, %v145_v40 }
 0x154   :  { %v245_v33 = vmul.f32 %v209_v14, %v153_v23  ;;  %v246_v34 = vmul.f32 %v210_v22, %v156_v24 }
 0x156   :  { %v160_v9 = vpop.permute.xlu1 %159  ;;  %v171_v17 = vpop.permute.xlu0 %170 }
 0x157   :  { %v167_v10 = vsel %vm165_vm6, %v160_v9, %v162_v3  ;;  %v168_v11 = vsel %vm165_vm6, %v158_v63, %v160_v9 }
 0x158   :  { %v247_v18 = vmul.f32 %v211_v7, %v168_v11  ;;  %v248_v21 = vmul.f32 %v212_v8, %v167_v10 }
 0x15a   :  { %v164_v28 = vpop.permute.xlu1 %163  ;;  %v456_v29 = vpack.c.bf16 %v248_v21, %v244_v13  ;;  %v458_v30 = vpack.c.bf16 %v247_v18, %v243_v12  ;;  %v175_v39 = vpop.permute.xlu0 %174 }
 0x15b   :  { %v166_v31 = vsel %vm165_vm6, %v162_v3, %v164_v28  ;;  %v169_v32 = vsel %vm165_vm6, %v164_v28, %v158_v63 }
 0x15c   :  { %v249_v35 = vmul.f32 %v213_v25, %v166_v31  ;;  %v250_v36 = vmul.f32 %v214_v27, %v169_v32  ;;  %457 = vmatprep.subr.bf16.mxu0 %v456_v29 }
 0x15d   :  { %459 = vmatpush1.bf16.msra.mxu0 %v458_v30 }
 0x15e   :  { %v173_v40 = vpop.permute.xlu1 %172  ;;  %v472_v41 = vpack.c.bf16 %v250_v36, %v246_v34  ;;  %v474_v42 = vpack.c.bf16 %v249_v35, %v245_v33 }
 0x15f   :  { %v180_v43 = vsel %vm178_vm7, %v173_v40, %v175_v39  ;;  %v181_v44 = vsel %vm178_vm7, %v171_v17, %v173_v40 }
 0x160   :  { %v251_v45 = vmul.f32 %v215_v37, %v181_v44  ;;  %v252_v46 = vmul.f32 %v216_v38, %v180_v43  ;;  %473 = vmatprep.subr.bf16.mxu1 %v472_v41 }
 0x161   :  { %475 = vmatpush1.bf16.msra.mxu1 %v474_v42 }
 0x162   :  { %v177_v50 = vpop.permute.xlu1 %176  ;;  %276 = vmatprep.subr.mxu0 %v252_v46 }
 0x163   :  { %v179_v51 = vsel %vm178_vm7, %v175_v39, %v177_v50  ;;  %v182_v52 = vsel %vm178_vm7, %v177_v50, %v171_v17  ;;  %277 = vmatpush1.msra.mxu0 %v251_v45 }
 0x164   :  { %v253_v53 = vmul.f32 %v217_v47, %v179_v51  ;;  %v254_v54 = vmul.f32 %v218_v48, %v182_v52  ;;  %438 = vmatmul.mubr.msk.f32.vlgmr.msra.gmra.mrb[0].mxu0 %vm256_vm8, %v255_v49 }
 0x166   :  { %347 = vmatprep.subr.mxu1 %v254_v54 }
 0x167   :  { %348 = vmatpush1.msra.mxu1 %v253_v53 }
 0x168   :  { %439 = vmatmul.mubr.msk.f32.vlgmr.msra.gmra.mrb[0].mxu1 %vm256_vm8, %v255_v49 }
 0x237   :  { %v326_v55 = vpop.f32.mrb[0].mxu0 }
 0x238   :  { %v406_v57 = vrot.slane %v326_v55, 4  ;;  %v328_v58 = vpop.f32.mrb[1].mxu0 }
 0x239   :  { %v407_v19 = vrot.slane %v328_v58, 4 }
 0x23a   :  { %v411_v60 = vsel %vm410_vm9, %v402_v56, %v406_v57  ;;  %415 = vst [vmem:[%s774_s5 + $0x10] sm:$0xf] %v406_v57 }
 0x23b   :  { %413 = vst [vmem:[%s774_s5] sm:$0xff] %v411_v60  ;;  %v412_v26 = vsel %vm410_vm9, %v403_v59, %v407_v19  ;;  %416 = vst [vmem:[%s774_s5 + $0x18] sm:$0xf] %v407_v19  ;;  %v397_v61 = vpop.f32.mrb[0].mxu1 }
 0x23c   :  { %414 = vst [vmem:[%s774_s5 + $0x8] sm:$0xff] %v412_v26  ;;  %v421_v62 = vrot.slane %v397_v61, 4  ;;  %v399_v63 = vpop.f32.mrb[1].mxu1 }
 0x23d   :  { %v422_v1 = vrot.slane %v399_v63, 4 }
 0x23e   :  { %v425_v2 = vsel %vm410_vm9, %v417_v15, %v421_v62  ;;  %442 = vst [vmem:[%s774_s5 + $0x30] sm:$0xf] %v421_v62 }
 0x23f   :  { %440 = vst [vmem:[%s774_s5 + $0x20] sm:$0xff] %v425_v2  ;;  %v426_v3 = vsel %vm410_vm9, %v418_v0, %v422_v1  ;;  %443 = vst [vmem:[%s774_s5 + $0x38] sm:$0xf] %v422_v1 }
 0x240   :  { %441 = vst [vmem:[%s774_s5 + $0x28] sm:$0xff] %v426_v3 }
 0x241   :  { %436 = vsyncpa [#allocation3], 1 }
 0x242   :  { %437 = vsyncpa [#allocation5], 1 }

</bundles_post_ra>
